<compile_context>
chip_gen: v6e
topology: v6e:2x2x1
jax: 0.10.0
libtpu: 0.0.40
codegen_flags: <defaults>
</compile_context>

<pallas_src>
import jax
import jax.numpy as jnp
from jax.experimental import pallas as pl
from jax.experimental.pallas import tpu as pltpu

_BN_EPS = 1e-5


def _bn_lanes(v, gamma, beta):
    """Train-mode BatchNorm over the lane axis (M = N*Ho*Wo) of a (C, M) f32 tile."""
    mean = jnp.mean(v, axis=1, keepdims=True)
    centered = v - mean
    var = jnp.mean(centered * centered, axis=1, keepdims=True)
    return centered * (gamma * jax.lax.rsqrt(var + _BN_EPS)) + beta


def _conv_shift_accum(w_ref, taps, mask_ref, Wo, M):
    """conv = sum_t  mask_t * roll(w_ref[t] @ src_t).

    One accumulating MXU matmul per tap; the f32 partial result is lane-rolled
    (XLU) into the output frame and border-masked (VPU).  The tap is produced,
    consumed and discarded, so no (ks*ks*C, M) patch matrix and no shifted copies
    of the (narrow-dtype) activations are ever materialized.
    """
    acc = None
    for t, (src, sr, sc) in enumerate(taps):
        z = jnp.dot(w_ref[t], src, preferred_element_type=jnp.float32)
        if (sr, sc) != (0, 0):
            shift = sr * Wo + sc
            z = pltpu.roll(z, shift=(-shift) % M, axis=1)
            idx = (sr + 1) * 3 + (sc + 1)
            z = z * mask_ref[idx:idx + 1, :]            # precomputed 0/1 border mask
        acc = z if acc is None else acc + z
    return acc


def _make_block_kernel(has_conv_identity, Wo, ks):
    pad = 1
    # conv2 (and stride-1 conv1) tap offsets on the output grid, tap t = di*ks + dj.
    offsets = [(di - pad, dj - pad) for di in range(ks) for dj in range(ks)]
    # stride-2 conv1: tap t reads phase (pr, pc) of x shifted by (dr, dc) on the
    # Ho x Wo output grid (space-to-batch decomposition of the strided conv).
    s2_taps = []
    for di in range(ks):
        pr, dr = ((1, -1), (0, 0), (1, 0))[di]
        for dj in range(ks):
            pc, dc = ((1, -1), (0, 0), (1, 0))[dj]
            s2_taps.append((pr * 2 + pc, dr, dc))

    def kernel(*refs):
        if has_conv_identity:
            (xs_ref, w1_ref, w2_ref, wi_ref, mask_ref,
             g1_ref, be1_ref, g2_ref, be2_ref, gi_ref, bei_ref,
             o_ref, h_ref) = refs
        else:
            (x_ref, xid_ref, w1_ref, w2_ref, mask_ref,
             g1_ref, be1_ref, g2_ref, be2_ref,
             o_ref, h_ref) = refs

        cd = h_ref.dtype
        M = o_ref.shape[1]
        j = pl.program_id(0)

        # ---- stage 1 (first Cout tile only): conv1 + BN1 + ReLU -> resident h ----
        # Conv biases omitted: cancelled exactly by train-mode BN mean subtraction.
        @pl.when(j == 0)
        def _():
            if has_conv_identity:
                phases = [xs_ref[p] for p in range(4)]           # (Cin, M) each, cd
                taps = [(phases[p], dr, dc) for (p, dr, dc) in s2_taps]
            else:
                x_c = x_ref[...].astype(cd)                      # cast once
                taps = [(x_c, oi, oj) for (oi, oj) in offsets]
            c1 = _conv_shift_accum(w1_ref, taps, mask_ref, Wo, M)
            h = jnp.maximum(_bn_lanes(c1, g1_ref[...], be1_ref[...]), 0.0)
            h_ref[...] = h.astype(cd)                            # cast once

        # ---- stage 2 (every Cout tile): conv2 + BN2 + identity + ReLU ------------
        h_c = h_ref[...]                                          # (Cout, M), cd
        taps2 = [(h_c, oi, oj) for (oi, oj) in offsets]
        c2 = _conv_shift_accum(w2_ref, taps2, mask_ref, Wo, M)    # (TC, M) f32
        y = _bn_lanes(c2, g2_ref[...], be2_ref[...])

        if has_conv_identity:
            # 1x1 stride-2 conv == plain matmul against the resident phase (0,0).
            ci = jnp.dot(wi_ref[...], xs_ref[0],
                         preferred_element_type=jnp.float32)
            y = y + _bn_lanes(ci, gi_ref[...], bei_ref[...])
        else:
            y = y + xid_ref[...]                                  # exact f32 residual
        o_ref[...] = jnp.maximum(y, 0.0).astype(o_ref.dtype)      # lane-dense store

    return kernel


def resnet_bloc_classic_forward(x_nchw, params, *, ks, stride, conv_in_identity,
                                compute_dtype=jnp.bfloat16, out_dtype=jnp.float32,
                                cout_tile=256, channel_major_out=False):
    """Forward of Resnet_bloc_classic.  NCHW in; NCHW out (or channel-major
    (Cout, N, Ho, Wo) when channel_major_out=True, for chaining blocks with zero
    transposes).  compute_dtype = MXU operand dtype (bf16 recommended on v6e/v7x);
    accumulation, rolls, masks and all BN math stay in f32."""
    N, Cin, H, W = x_nchw.shape
    Cout = params["w1"].shape[0]
    assert ks == 3, "pad=1 convs + residual add require ks == 3"
    assert stride in (1, 2)
    pad = 1
    Ho = (H + 2 * pad - ks) // stride + 1
    Wo = (W + 2 * pad - ks) // stride + 1
    M = N * Ho * Wo
    cd = compute_dtype

    # Cout tiling (grid axis).  At these toy sizes it is one step; at real sizes it
    # bounds VMEM and overlaps the per-tile w2 / BN-param / output DMAs with MXU.
    TC = min(cout_tile, Cout)
    assert Cout % TC == 0 and TC % 8 == 0, (Cout, TC)
    grid = (Cout // TC,)

    # Weights: PyTorch (Cout, Cin', kh, kw) -> (kh*kw, Cout, Cin'): one (Cout, Cin')
    # slab per tap so the kernel accumulates tap-by-tap (no big patch matrix).
    w1t = jnp.transpose(params["w1"], (2, 3, 0, 1)).reshape(ks * ks, Cout, Cin).astype(cd)
    w2t = jnp.transpose(params["w2"], (2, 3, 0, 1)).reshape(ks * ks, Cout, Cout).astype(cd)

    def bnp(v):                                        # BN params as (C, 1) f32
        return v.reshape(-1, 1).astype(jnp.float32)

    # Precomputed multiplicative border masks, one row per tap offset (oi, oj) in
    # {-1,0,1}^2, row index (oi+1)*3+(oj+1); the Ho*Wo pattern tiles over N images.
    pos = jnp.arange(Ho * Wo, dtype=jnp.int32)
    ii, jj = pos // Wo, pos % Wo
    rows = []
    for oi in (-1, 0, 1):
        for oj in (-1, 0, 1):
            rows.append((ii + oi >= 0) & (ii + oi < Ho) &
                        (jj + oj >= 0) & (jj + oj < Wo))
    mask = jnp.tile(jnp.stack(rows, axis=0).astype(jnp.float32), (1, N))   # (9, M)

    kernel = _make_block_kernel(conv_in_identity, Wo, ks)

    if conv_in_identity:
        assert stride == 2 and H % 2 == 0 and W % 2 == 0
        # Space-to-batch: the 4 stride-2 phases of x, channel-major (Cin, M) each.
        # Same byte count as x (no 9x im2col blow-up); phase (0,0) is also the
        # input of the 1x1 / stride-2 identity conv inside the kernel.
        phases = []
        for p in (0, 1):
            for q in (0, 1):
                ph = x_nchw[:, :, p::2, q::2]                      # (N, Cin, Ho, Wo)
                phases.append(jnp.transpose(ph, (1, 0, 2, 3)).reshape(Cin, M))
        xs = jnp.stack(phases, axis=0).astype(cd)                  # (4, Cin, M)
        wim = params["wi"].reshape(Cout, Cin).astype(cd)
        args = [xs, w1t, w2t, wim, mask,
                bnp(params["g1"]), bnp(params["be1"]),
                bnp(params["g2"]), bnp(params["be2"]),
                bnp(params["gi"]), bnp(params["bei"])]
        in_specs = [
            pl.BlockSpec((4, Cin, M), lambda j: (0, 0, 0)),          # x phases (resident)
            pl.BlockSpec((ks * ks, Cout, Cin), lambda j: (0, 0, 0)), # w1 (resident)
            pl.BlockSpec((ks * ks, TC, Cout), lambda j: (0, j, 0)),  # w2 tile
            pl.BlockSpec((TC, Cin), lambda j: (j, 0)),               # wi tile
            pl.BlockSpec((9, M), lambda j: (0, 0)),                  # border masks
            pl.BlockSpec((Cout, 1), lambda j: (0, 0)),               # g1
            pl.BlockSpec((Cout, 1), lambda j: (0, 0)),               # be1
            pl.BlockSpec((TC, 1), lambda j: (j, 0)),                 # g2 tile
            pl.BlockSpec((TC, 1), lambda j: (j, 0)),                 # be2 tile
            pl.BlockSpec((TC, 1), lambda j: (j, 0)),                 # gi tile
            pl.BlockSpec((TC, 1), lambda j: (j, 0)),                 # bei tile
        ]
    else:
        assert stride == 1 and Cin == Cout, (
            "identity path without conv requires stride == 1 and Cin == Cout")
        # x channel-major, f32 (exact residual); the kernel casts it to the compute
        # dtype once for the conv1 taps.  Passed as two views of the same buffer:
        # full (stage 1, resident) + per-Cout-tile (residual add, pipelined).
        x_cm = jnp.transpose(x_nchw, (1, 0, 2, 3)).reshape(Cin, M).astype(jnp.float32)
        args = [x_cm, x_cm, w1t, w2t, mask,
                bnp(params["g1"]), bnp(params["be1"]),
                bnp(params["g2"]), bnp(params["be2"])]
        in_specs = [
            pl.BlockSpec((Cin, M), lambda j: (0, 0)),                # x (resident)
            pl.BlockSpec((TC, M), lambda j: (j, 0)),                 # residual tile
            pl.BlockSpec((ks * ks, Cout, Cin), lambda j: (0, 0, 0)), # w1 (resident)
            pl.BlockSpec((ks * ks, TC, Cout), lambda j: (0, j, 0)),  # w2 tile
            pl.BlockSpec((9, M), lambda j: (0, 0)),                  # border masks
            pl.BlockSpec((Cout, 1), lambda j: (0, 0)),               # g1
            pl.BlockSpec((Cout, 1), lambda j: (0, 0)),               # be1
            pl.BlockSpec((TC, 1), lambda j: (j, 0)),                 # g2 tile
            pl.BlockSpec((TC, 1), lambda j: (j, 0)),                 # be2 tile
        ]

    # VMEM / cost hints (stays far below v7x's 64 MiB at these tile sizes).
    in_bytes = sum(int(a.size) * a.dtype.itemsize for a in args)
    out_bytes = Cout * M * jnp.dtype(out_dtype).itemsize
    h_bytes = Cout * M * jnp.dtype(cd).itemsize
    vmem_limit = int(min(64 * 1024 * 1024,
                         max(8 * 1024 * 1024,
                             4 * (in_bytes + out_bytes + h_bytes))))
    flops = 2 * M * ks * ks * Cout * (Cin + Cout) + 12 * Cout * M
    if conv_in_identity:
        flops += 2 * M * Cin * Cout
    cost = pl.CostEstimate(flops=int(flops), transcendentals=int(3 * Cout),
                           bytes_accessed=int(in_bytes + out_bytes))

    out_cm = pl.pallas_call(
        kernel,
        out_shape=jax.ShapeDtypeStruct((Cout, M), out_dtype),
        grid_spec=pltpu.PrefetchScalarGridSpec(
            num_scalar_prefetch=0,
            grid=grid,
            in_specs=in_specs,
            out_specs=pl.BlockSpec((TC, M), lambda j: (j, 0)),
            scratch_shapes=[pltpu.VMEM((Cout, M), cd)],              # resident h
        ),
        compiler_params=pltpu.CompilerParams(
            # The Cout axis must stay "arbitrary": stage 1 fills the shared h
            # scratch at step 0.  Never parallelize M (BN reduces over it).
            dimension_semantics=("arbitrary",),
            vmem_limit_bytes=vmem_limit),
        cost_estimate=cost,
    )(*args)

    out_cm = out_cm.reshape(Cout, N, Ho, Wo)
    if channel_major_out:
        # Directly consumable as the next block's channel-major input (no NCHW
        # round trip between chained blocks).
        return out_cm
    return jnp.transpose(out_cm, (1, 0, 2, 3))                        # NCHW


# ----------------------- pure-JAX f32 reference for checking -----------------------
def _ref_forward(x, params, ks, stride, conv_in_identity):
    def conv(x_, w, b, s, p):
        y = jax.lax.conv_general_dilated(
            x_, w, window_strides=(s, s), padding=[(p, p), (p, p)],
            dimension_numbers=("NCHW", "OIHW", "NCHW"))
        return y + b[None, :, None, None]

    def bn(x_, g, be):
        m = jnp.mean(x_, axis=(0, 2, 3), keepdims=True)
        v = jnp.mean((x_ - m) ** 2, axis=(0, 2, 3), keepdims=True)
        return (x_ - m) / jnp.sqrt(v + _BN_EPS) * g[None, :, None, None] \
            + be[None, :, None, None]

    h = jax.nn.relu(bn(conv(x, params["w1"], params["b1"], stride, 1),
                       params["g1"], params["be1"]))
    h2 = bn(conv(h, params["w2"], params["b2"], 1, 1), params["g2"], params["be2"])
    if conv_in_identity:
        ident = bn(conv(x, params["wi"], params["bi"], 2, 0),
                   params["gi"], params["bei"])
    else:
        ident = x
    return jax.nn.relu(h2 + ident)


if __name__ == "__main__":
    key = jax.random.PRNGKey(0)
    kk = jax.random.split(key, 44)

    def nrm(k, shape, scale=0.1):
        return scale * jax.random.normal(k, shape, dtype=jnp.float32)

    def make_params(keys, cin, cout, ks, conv_in_identity):
        p = dict(
            w1=nrm(keys[0], (cout, cin, ks, ks)),  b1=nrm(keys[1], (cout,)),
            g1=1.0 + nrm(keys[2], (cout,)),        be1=nrm(keys[3], (cout,)),
            w2=nrm(keys[4], (cout, cout, ks, ks)), b2=nrm(keys[5], (cout,)),
            g2=1.0 + nrm(keys[6], (cout,)),        be2=nrm(keys[7], (cout,)),
        )
        if conv_in_identity:
            p.update(
                wi=nrm(keys[8], (cout, cin, 1, 1)), bi=nrm(keys[9], (cout,)),
                gi=1.0 + nrm(keys[10], (cout,)),    bei=nrm(keys[11], (cout,)),
            )
        return p

    def check(x, params, ks, stride, conv_id, compute_dtype, tol, **kw):
        ref = _ref_forward(x, params, ks, stride, conv_id)
        out = jax.block_until_ready(
            resnet_bloc_classic_forward(x, params, ks=ks, stride=stride,
                                        conv_in_identity=conv_id,
                                        compute_dtype=compute_dtype, **kw))
        assert out.shape == ref.shape, (out.shape, ref.shape)
        err = float(jnp.max(jnp.abs(out - ref)))
        assert jnp.allclose(out, ref, atol=tol, rtol=tol), err
        return err

    KS = 3

    # A) Resnet_bloc_classic(4, 8, ks=3, stride=2, conv_in_identity=True)
    pA = make_params(kk[0:12], 4, 8, KS, True)
    xA = jax.random.normal(kk[12], (2, 4, 16, 16), dtype=jnp.float32)
    check(xA, pA, KS, 2, True, jnp.float32, 3e-2)     # exact-math path
    check(xA, pA, KS, 2, True, jnp.bfloat16, 7e-2)    # bf16 MXU operands (default)

    # B) Resnet_bloc_classic(8, 8, ks=3, stride=1, conv_in_identity=False)
    pB = make_params(kk[13:21], 8, 8, KS, False)
    xB = jax.random.normal(kk[21], (2, 8, 8, 8), dtype=jnp.float32)
    check(xB, pB, KS, 1, False, jnp.float32, 3e-2)

    # C) Cout=16 with cout_tile=8 -> grid=(2,): exercises the Cout-tiled path
    #    (tiled w2 / wi / BN params / output, h reused from scratch at step 1).
    pC = make_params(kk[22:34], 4, 16, KS, True)
    xC = jax.random.normal(kk[34], (2, 4, 16, 16), dtype=jnp.float32)
    check(xC, pC, KS, 2, True, jnp.float32, 3e-2, cout_tile=8)

    # D) Cout=16 no-conv identity with cout_tile=8 -> grid=(2,): exercises the
    #    per-tile residual view.
    pD = make_params(kk[35:43], 16, 16, KS, False)
    xD = jax.random.normal(kk[43], (2, 16, 8, 8), dtype=jnp.float32)
    check(xD, pD, KS, 1, False, jnp.float32, 3e-2, cout_tile=8)

    print("KERNEL_OK")
</pallas_src>

<mosaic_0001>
module attributes {stable_mosaic.version = 11 : i64} {
  func.func @kernel(%arg0: i32, %arg1: memref<4x4x128xf32, #tpu.memory_space<vmem>>, %arg2: memref<9x8x4xf32, #tpu.memory_space<vmem>>, %arg3: memref<9x8x8xf32, #tpu.memory_space<vmem>>, %arg4: memref<8x4xf32, #tpu.memory_space<vmem>>, %arg5: memref<9x128xf32, #tpu.memory_space<vmem>>, %arg6: memref<8x1xf32, #tpu.memory_space<vmem>>, %arg7: memref<8x1xf32, #tpu.memory_space<vmem>>, %arg8: memref<8x1xf32, #tpu.memory_space<vmem>>, %arg9: memref<8x1xf32, #tpu.memory_space<vmem>>, %arg10: memref<8x1xf32, #tpu.memory_space<vmem>>, %arg11: memref<8x1xf32, #tpu.memory_space<vmem>>, %arg12: memref<8x128xf32, #tpu.memory_space<vmem>>, %arg13: memref<8x128xf32, #tpu.memory_space<vmem>>) attributes {dimension_semantics = [#tpu.dimension_semantics<arbitrary>], iteration_bounds = array<i64: 1>, scalar_prefetch = 0 : i64, scratch_operands = 1 : i64, tpu.core_type = #tpu.core_type<tc>, window_params = [{pipeline_mode = #tpu.pipeline_mode<synchronous>, transform_indices = @transform_0, window_bounds = array<i64: 4, 4, 128>}, {pipeline_mode = #tpu.pipeline_mode<synchronous>, transform_indices = @transform_1, window_bounds = array<i64: 9, 8, 4>}, {transform_indices = @transform_2, window_bounds = array<i64: 9, 8, 8>}, {transform_indices = @transform_3, window_bounds = array<i64: 8, 4>}, {pipeline_mode = #tpu.pipeline_mode<synchronous>, transform_indices = @transform_4, window_bounds = array<i64: 9, 128>}, {pipeline_mode = #tpu.pipeline_mode<synchronous>, transform_indices = @transform_5, window_bounds = array<i64: 8, 1>}, {pipeline_mode = #tpu.pipeline_mode<synchronous>, transform_indices = @transform_6, window_bounds = array<i64: 8, 1>}, {transform_indices = @transform_7, window_bounds = array<i64: 8, 1>}, {transform_indices = @transform_8, window_bounds = array<i64: 8, 1>}, {transform_indices = @transform_9, window_bounds = array<i64: 8, 1>}, {transform_indices = @transform_10, window_bounds = array<i64: 8, 1>}, {transform_indices = @transform_11, window_bounds = array<i64: 8, 128>}]} {
    %c0_i32 = arith.constant 0 : i32
    %0 = arith.cmpi eq, %arg0, %c0_i32 : i32
    %1 = arith.extui %0 : i1 to i32
    %c0_i32_0 = arith.constant 0 : i32
    %2 = arith.cmpi ne, %1, %c0_i32_0 : i32
    scf.if %2 {
      %c0_72 = arith.constant 0 : index
      %c0_73 = arith.constant 0 : index
      %c0_74 = arith.constant 0 : index
      %121 = vector.load %arg1[%c0_72, %c0_73, %c0_74] : memref<4x4x128xf32, #tpu.memory_space<vmem>>, vector<1x4x128xf32>
      %122 = vector.shape_cast %121 : vector<1x4x128xf32> to vector<4x128xf32>
      %c1_75 = arith.constant 1 : index
      %c0_76 = arith.constant 0 : index
      %c0_77 = arith.constant 0 : index
      %123 = vector.load %arg1[%c1_75, %c0_76, %c0_77] : memref<4x4x128xf32, #tpu.memory_space<vmem>>, vector<1x4x128xf32>
      %124 = vector.shape_cast %123 : vector<1x4x128xf32> to vector<4x128xf32>
      %c2_78 = arith.constant 2 : index
      %c0_79 = arith.constant 0 : index
      %c0_80 = arith.constant 0 : index
      %125 = vector.load %arg1[%c2_78, %c0_79, %c0_80] : memref<4x4x128xf32, #tpu.memory_space<vmem>>, vector<1x4x128xf32>
      %126 = vector.shape_cast %125 : vector<1x4x128xf32> to vector<4x128xf32>
      %c3_81 = arith.constant 3 : index
      %c0_82 = arith.constant 0 : index
      %c0_83 = arith.constant 0 : index
      %127 = vector.load %arg1[%c3_81, %c0_82, %c0_83] : memref<4x4x128xf32, #tpu.memory_space<vmem>>, vector<1x4x128xf32>
      %128 = vector.shape_cast %127 : vector<1x4x128xf32> to vector<4x128xf32>
      %c0_84 = arith.constant 0 : index
      %c0_85 = arith.constant 0 : index
      %c0_86 = arith.constant 0 : index
      %129 = vector.load %arg2[%c0_84, %c0_85, %c0_86] : memref<9x8x4xf32, #tpu.memory_space<vmem>>, vector<1x8x4xf32>
      %130 = vector.shape_cast %129 : vector<1x8x4xf32> to vector<8x4xf32>
      %cst_87 = arith.constant dense<0.000000e+00> : vector<8x128xf32>
      %131 = tpu.matmul %130, %128, %cst_87 {dimension_numbers = #tpu.dot_dimension_numbers<[1], [0], [0], [1], [0, 0, 1, 1], [], []>} : vector<8x4xf32>, vector<4x128xf32>, vector<8x128xf32> -> vector<8x128xf32>
      %c9_i32_88 = arith.constant 9 : i32
      %132 = tpu.dynamic_rotate %131 by %c9_i32_88 dim 1 : vector<8x128xf32>, i32 -> vector<8x128xf32>
      %c0_89 = arith.constant 0 : index
      %c0_90 = arith.constant 0 : index
      %133 = vector.load %arg5[%c0_89, %c0_90] : memref<9x128xf32, #tpu.memory_space<vmem>>, vector<1x128xf32>
      %134 = vector.broadcast %133 : vector<1x128xf32> to vector<8x128xf32>
      %135 = arith.mulf %132, %134 : vector<8x128xf32>
      %c1_91 = arith.constant 1 : index
      %c0_92 = arith.constant 0 : index
      %c0_93 = arith.constant 0 : index
      %136 = vector.load %arg2[%c1_91, %c0_92, %c0_93] : memref<9x8x4xf32, #tpu.memory_space<vmem>>, vector<1x8x4xf32>
      %137 = vector.shape_cast %136 : vector<1x8x4xf32> to vector<8x4xf32>
      %cst_94 = arith.constant dense<0.000000e+00> : vector<8x128xf32>
      %138 = tpu.matmul %137, %126, %cst_94 {dimension_numbers = #tpu.dot_dimension_numbers<[1], [0], [0], [1], [0, 0, 1, 1], [], []>} : vector<8x4xf32>, vector<4x128xf32>, vector<8x128xf32> -> vector<8x128xf32>
      %c8_i32_95 = arith.constant 8 : i32
      %139 = tpu.dynamic_rotate %138 by %c8_i32_95 dim 1 : vector<8x128xf32>, i32 -> vector<8x128xf32>
      %c1_96 = arith.constant 1 : index
      %c0_97 = arith.constant 0 : index
      %140 = vector.load %arg5[%c1_96, %c0_97] : memref<9x128xf32, #tpu.memory_space<vmem>>, vector<1x128xf32>
      %141 = vector.broadcast %140 : vector<1x128xf32> to vector<8x128xf32>
      %142 = arith.mulf %139, %141 : vector<8x128xf32>
      %143 = arith.addf %135, %142 : vector<8x128xf32>
      %c2_98 = arith.constant 2 : index
      %c0_99 = arith.constant 0 : index
      %c0_100 = arith.constant 0 : index
      %144 = vector.load %arg2[%c2_98, %c0_99, %c0_100] : memref<9x8x4xf32, #tpu.memory_space<vmem>>, vector<1x8x4xf32>
      %145 = vector.shape_cast %144 : vector<1x8x4xf32> to vector<8x4xf32>
      %cst_101 = arith.constant dense<0.000000e+00> : vector<8x128xf32>
      %146 = tpu.matmul %145, %128, %cst_101 {dimension_numbers = #tpu.dot_dimension_numbers<[1], [0], [0], [1], [0, 0, 1, 1], [], []>} : vector<8x4xf32>, vector<4x128xf32>, vector<8x128xf32> -> vector<8x128xf32>
      %c8_i32_102 = arith.constant 8 : i32
      %147 = tpu.dynamic_rotate %146 by %c8_i32_102 dim 1 : vector<8x128xf32>, i32 -> vector<8x128xf32>
      %c1_103 = arith.constant 1 : index
      %c0_104 = arith.constant 0 : index
      %148 = vector.load %arg5[%c1_103, %c0_104] : memref<9x128xf32, #tpu.memory_space<vmem>>, vector<1x128xf32>
      %149 = vector.broadcast %148 : vector<1x128xf32> to vector<8x128xf32>
      %150 = arith.mulf %147, %149 : vector<8x128xf32>
      %151 = arith.addf %143, %150 : vector<8x128xf32>
      %c3_105 = arith.constant 3 : index
      %c0_106 = arith.constant 0 : index
      %c0_107 = arith.constant 0 : index
      %152 = vector.load %arg2[%c3_105, %c0_106, %c0_107] : memref<9x8x4xf32, #tpu.memory_space<vmem>>, vector<1x8x4xf32>
      %153 = vector.shape_cast %152 : vector<1x8x4xf32> to vector<8x4xf32>
      %cst_108 = arith.constant dense<0.000000e+00> : vector<8x128xf32>
      %154 = tpu.matmul %153, %124, %cst_108 {dimension_numbers = #tpu.dot_dimension_numbers<[1], [0], [0], [1], [0, 0, 1, 1], [], []>} : vector<8x4xf32>, vector<4x128xf32>, vector<8x128xf32> -> vector<8x128xf32>
      %c1_i32_109 = arith.constant 1 : i32
      %155 = tpu.dynamic_rotate %154 by %c1_i32_109 dim 1 : vector<8x128xf32>, i32 -> vector<8x128xf32>
      %c3_110 = arith.constant 3 : index
      %c0_111 = arith.constant 0 : index
      %156 = vector.load %arg5[%c3_110, %c0_111] : memref<9x128xf32, #tpu.memory_space<vmem>>, vector<1x128xf32>
      %157 = vector.broadcast %156 : vector<1x128xf32> to vector<8x128xf32>
      %158 = arith.mulf %155, %157 : vector<8x128xf32>
      %159 = arith.addf %151, %158 : vector<8x128xf32>
      %c4_112 = arith.constant 4 : index
      %c0_113 = arith.constant 0 : index
      %c0_114 = arith.constant 0 : index
      %160 = vector.load %arg2[%c4_112, %c0_113, %c0_114] : memref<9x8x4xf32, #tpu.memory_space<vmem>>, vector<1x8x4xf32>
      %161 = vector.shape_cast %160 : vector<1x8x4xf32> to vector<8x4xf32>
      %cst_115 = arith.constant dense<0.000000e+00> : vector<8x128xf32>
      %162 = tpu.matmul %161, %122, %cst_115 {dimension_numbers = #tpu.dot_dimension_numbers<[1], [0], [0], [1], [0, 0, 1, 1], [], []>} : vector<8x4xf32>, vector<4x128xf32>, vector<8x128xf32> -> vector<8x128xf32>
      %163 = arith.addf %159, %162 : vector<8x128xf32>
      %c5_116 = arith.constant 5 : index
      %c0_117 = arith.constant 0 : index
      %c0_118 = arith.constant 0 : index
      %164 = vector.load %arg2[%c5_116, %c0_117, %c0_118] : memref<9x8x4xf32, #tpu.memory_space<vmem>>, vector<1x8x4xf32>
      %165 = vector.shape_cast %164 : vector<1x8x4xf32> to vector<8x4xf32>
      %cst_119 = arith.constant dense<0.000000e+00> : vector<8x128xf32>
      %166 = tpu.matmul %165, %124, %cst_119 {dimension_numbers = #tpu.dot_dimension_numbers<[1], [0], [0], [1], [0, 0, 1, 1], [], []>} : vector<8x4xf32>, vector<4x128xf32>, vector<8x128xf32> -> vector<8x128xf32>
      %167 = arith.addf %163, %166 : vector<8x128xf32>
      %c6_120 = arith.constant 6 : index
      %c0_121 = arith.constant 0 : index
      %c0_122 = arith.constant 0 : index
      %168 = vector.load %arg2[%c6_120, %c0_121, %c0_122] : memref<9x8x4xf32, #tpu.memory_space<vmem>>, vector<1x8x4xf32>
      %169 = vector.shape_cast %168 : vector<1x8x4xf32> to vector<8x4xf32>
      %cst_123 = arith.constant dense<0.000000e+00> : vector<8x128xf32>
      %170 = tpu.matmul %169, %128, %cst_123 {dimension_numbers = #tpu.dot_dimension_numbers<[1], [0], [0], [1], [0, 0, 1, 1], [], []>} : vector<8x4xf32>, vector<4x128xf32>, vector<8x128xf32> -> vector<8x128xf32>
      %c1_i32_124 = arith.constant 1 : i32
      %171 = tpu.dynamic_rotate %170 by %c1_i32_124 dim 1 : vector<8x128xf32>, i32 -> vector<8x128xf32>
      %c3_125 = arith.constant 3 : index
      %c0_126 = arith.constant 0 : index
      %172 = vector.load %arg5[%c3_125, %c0_126] : memref<9x128xf32, #tpu.memory_space<vmem>>, vector<1x128xf32>
      %173 = vector.broadcast %172 : vector<1x128xf32> to vector<8x128xf32>
      %174 = arith.mulf %171, %173 : vector<8x128xf32>
      %175 = arith.addf %167, %174 : vector<8x128xf32>
      %c7_127 = arith.constant 7 : index
      %c0_128 = arith.constant 0 : index
      %c0_129 = arith.constant 0 : index
      %176 = vector.load %arg2[%c7_127, %c0_128, %c0_129] : memref<9x8x4xf32, #tpu.memory_space<vmem>>, vector<1x8x4xf32>
      %177 = vector.shape_cast %176 : vector<1x8x4xf32> to vector<8x4xf32>
      %cst_130 = arith.constant dense<0.000000e+00> : vector<8x128xf32>
      %178 = tpu.matmul %177, %126, %cst_130 {dimension_numbers = #tpu.dot_dimension_numbers<[1], [0], [0], [1], [0, 0, 1, 1], [], []>} : vector<8x4xf32>, vector<4x128xf32>, vector<8x128xf32> -> vector<8x128xf32>
      %179 = arith.addf %175, %178 : vector<8x128xf32>
      %c8_131 = arith.constant 8 : index
      %c0_132 = arith.constant 0 : index
      %c0_133 = arith.constant 0 : index
      %180 = vector.load %arg2[%c8_131, %c0_132, %c0_133] : memref<9x8x4xf32, #tpu.memory_space<vmem>>, vector<1x8x4xf32>
      %181 = vector.shape_cast %180 : vector<1x8x4xf32> to vector<8x4xf32>
      %cst_134 = arith.constant dense<0.000000e+00> : vector<8x128xf32>
      %182 = tpu.matmul %181, %128, %cst_134 {dimension_numbers = #tpu.dot_dimension_numbers<[1], [0], [0], [1], [0, 0, 1, 1], [], []>} : vector<8x4xf32>, vector<4x128xf32>, vector<8x128xf32> -> vector<8x128xf32>
      %183 = arith.addf %179, %182 : vector<8x128xf32>
      %c0_135 = arith.constant 0 : index
      %c0_136 = arith.constant 0 : index
      %184 = vector.load %arg6[%c0_135, %c0_136] : memref<8x1xf32, #tpu.memory_space<vmem>>, vector<8x1xf32>
      %c0_137 = arith.constant 0 : index
      %c0_138 = arith.constant 0 : index
      %185 = vector.load %arg7[%c0_137, %c0_138] : memref<8x1xf32, #tpu.memory_space<vmem>>, vector<8x1xf32>
      %cst_139 = arith.constant dense<0.000000e+00> : vector<8xf32>
      %186 = vector.multi_reduction <add>, %183, %cst_139 [1] : vector<8x128xf32> to vector<8xf32>
      %187 = vector.shape_cast %186 : vector<8xf32> to vector<8x1xf32>
      %cst_140 = arith.constant 1.280000e+02 : f32
      %188 = vector.broadcast %cst_140 : f32 to vector<8x1xf32>
      %189 = arith.divf %187, %188 : vector<8x1xf32>
      %190 = vector.broadcast %189 : vector<8x1xf32> to vector<8x128xf32>
      %191 = arith.subf %183, %190 : vector<8x128xf32>
      %192 = arith.mulf %191, %191 : vector<8x128xf32>
      %cst_141 = arith.constant dense<0.000000e+00> : vector<8xf32>
      %193 = vector.multi_reduction <add>, %192, %cst_141 [1] : vector<8x128xf32> to vector<8xf32>
      %194 = vector.shape_cast %193 : vector<8xf32> to vector<8x1xf32>
      %cst_142 = arith.constant 1.280000e+02 : f32
      %195 = vector.broadcast %cst_142 : f32 to vector<8x1xf32>
      %196 = arith.divf %194, %195 : vector<8x1xf32>
      %cst_143 = arith.constant 9.99999974E-6 : f32
      %197 = vector.broadcast %cst_143 : f32 to vector<8x1xf32>
      %198 = arith.addf %196, %197 : vector<8x1xf32>
      %199 = math.rsqrt %198 : vector<8x1xf32>
      %200 = arith.mulf %184, %199 : vector<8x1xf32>
      %201 = vector.broadcast %200 : vector<8x1xf32> to vector<8x128xf32>
      %202 = arith.mulf %191, %201 : vector<8x128xf32>
      %203 = vector.broadcast %185 : vector<8x1xf32> to vector<8x128xf32>
      %204 = arith.addf %202, %203 : vector<8x128xf32>
      %cst_144 = arith.constant 0.000000e+00 : f32
      %205 = vector.broadcast %cst_144 : f32 to vector<8x128xf32>
      %206 = arith.maximumf %204, %205 : vector<8x128xf32>
      %c0_145 = arith.constant 0 : index
      %c0_146 = arith.constant 0 : index
      %207 = vector.load %arg13[%c0_145, %c0_146] : memref<8x128xf32, #tpu.memory_space<vmem>>, vector<8x128xf32>
      tpu.vector_store %arg13[%c0_145, %c0_146], %206 {strides = array<i32>} : memref<8x128xf32, #tpu.memory_space<vmem>>, vector<8x128xf32>,
    } else {
    }
    %c0 = arith.constant 0 : index
    %c0_1 = arith.constant 0 : index
    %3 = vector.load %arg13[%c0, %c0_1] : memref<8x128xf32, #tpu.memory_space<vmem>>, vector<8x128xf32>
    %c0_2 = arith.constant 0 : index
    %c0_3 = arith.constant 0 : index
    %c0_4 = arith.constant 0 : index
    %4 = vector.load %arg3[%c0_2, %c0_3, %c0_4] : memref<9x8x8xf32, #tpu.memory_space<vmem>>, vector<1x8x8xf32>
    %5 = vector.shape_cast %4 : vector<1x8x8xf32> to vector<8x8xf32>
    %cst = arith.constant dense<0.000000e+00> : vector<8x128xf32>
    %6 = tpu.matmul %5, %3, %cst {dimension_numbers = #tpu.dot_dimension_numbers<[1], [0], [0], [1], [0, 0, 1, 1], [], []>} : vector<8x8xf32>, vector<8x128xf32>, vector<8x128xf32> -> vector<8x128xf32>
    %c9_i32 = arith.constant 9 : i32
    %7 = tpu.dynamic_rotate %6 by %c9_i32 dim 1 : vector<8x128xf32>, i32 -> vector<8x128xf32>
    %c0_5 = arith.constant 0 : index
    %c0_6 = arith.constant 0 : index
    %8 = vector.load %arg5[%c0_5, %c0_6] : memref<9x128xf32, #tpu.memory_space<vmem>>, vector<1x128xf32>
    %9 = vector.broadcast %8 : vector<1x128xf32> to vector<8x128xf32>
    %10 = arith.mulf %7, %9 : vector<8x128xf32>
    %c1 = arith.constant 1 : index
    %c0_7 = arith.constant 0 : index
    %c0_8 = arith.constant 0 : index
    %11 = vector.load %arg3[%c1, %c0_7, %c0_8] : memref<9x8x8xf32, #tpu.memory_space<vmem>>, vector<1x8x8xf32>
    %12 = vector.shape_cast %11 : vector<1x8x8xf32> to vector<8x8xf32>
    %cst_9 = arith.constant dense<0.000000e+00> : vector<8x128xf32>
    %13 = tpu.matmul %12, %3, %cst_9 {dimension_numbers = #tpu.dot_dimension_numbers<[1], [0], [0], [1], [0, 0, 1, 1], [], []>} : vector<8x8xf32>, vector<8x128xf32>, vector<8x128xf32> -> vector<8x128xf32>
    %c8_i32 = arith.constant 8 : i32
    %14 = tpu.dynamic_rotate %13 by %c8_i32 dim 1 : vector<8x128xf32>, i32 -> vector<8x128xf32>
    %c1_10 = arith.constant 1 : index
    %c0_11 = arith.constant 0 : index
    %15 = vector.load %arg5[%c1_10, %c0_11] : memref<9x128xf32, #tpu.memory_space<vmem>>, vector<1x128xf32>
    %16 = vector.broadcast %15 : vector<1x128xf32> to vector<8x128xf32>
    %17 = arith.mulf %14, %16 : vector<8x128xf32>
    %18 = arith.addf %10, %17 : vector<8x128xf32>
    %c2 = arith.constant 2 : index
    %c0_12 = arith.constant 0 : index
    %c0_13 = arith.constant 0 : index
    %19 = vector.load %arg3[%c2, %c0_12, %c0_13] : memref<9x8x8xf32, #tpu.memory_space<vmem>>, vector<1x8x8xf32>
    %20 = vector.shape_cast %19 : vector<1x8x8xf32> to vector<8x8xf32>
    %cst_14 = arith.constant dense<0.000000e+00> : vector<8x128xf32>
    %21 = tpu.matmul %20, %3, %cst_14 {dimension_numbers = #tpu.dot_dimension_numbers<[1], [0], [0], [1], [0, 0, 1, 1], [], []>} : vector<8x8xf32>, vector<8x128xf32>, vector<8x128xf32> -> vector<8x128xf32>
    %c7_i32 = arith.constant 7 : i32
    %22 = tpu.dynamic_rotate %21 by %c7_i32 dim 1 : vector<8x128xf32>, i32 -> vector<8x128xf32>
    %c2_15 = arith.constant 2 : index
    %c0_16 = arith.constant 0 : index
    %23 = vector.load %arg5[%c2_15, %c0_16] : memref<9x128xf32, #tpu.memory_space<vmem>>, vector<1x128xf32>
    %24 = vector.broadcast %23 : vector<1x128xf32> to vector<8x128xf32>
    %25 = arith.mulf %22, %24 : vector<8x128xf32>
    %26 = arith.addf %18, %25 : vector<8x128xf32>
    %c3 = arith.constant 3 : index
    %c0_17 = arith.constant 0 : index
    %c0_18 = arith.constant 0 : index
    %27 = vector.load %arg3[%c3, %c0_17, %c0_18] : memref<9x8x8xf32, #tpu.memory_space<vmem>>, vector<1x8x8xf32>
    %28 = vector.shape_cast %27 : vector<1x8x8xf32> to vector<8x8xf32>
    %cst_19 = arith.constant dense<0.000000e+00> : vector<8x128xf32>
    %29 = tpu.matmul %28, %3, %cst_19 {dimension_numbers = #tpu.dot_dimension_numbers<[1], [0], [0], [1], [0, 0, 1, 1], [], []>} : vector<8x8xf32>, vector<8x128xf32>, vector<8x128xf32> -> vector<8x128xf32>
    %c1_i32 = arith.constant 1 : i32
    %30 = tpu.dynamic_rotate %29 by %c1_i32 dim 1 : vector<8x128xf32>, i32 -> vector<8x128xf32>
    %c3_20 = arith.constant 3 : index
    %c0_21 = arith.constant 0 : index
    %31 = vector.load %arg5[%c3_20, %c0_21] : memref<9x128xf32, #tpu.memory_space<vmem>>, vector<1x128xf32>
    %32 = vector.broadcast %31 : vector<1x128xf32> to vector<8x128xf32>
    %33 = arith.mulf %30, %32 : vector<8x128xf32>
    %34 = arith.addf %26, %33 : vector<8x128xf32>
    %c4 = arith.constant 4 : index
    %c0_22 = arith.constant 0 : index
    %c0_23 = arith.constant 0 : index
    %35 = vector.load %arg3[%c4, %c0_22, %c0_23] : memref<9x8x8xf32, #tpu.memory_space<vmem>>, vector<1x8x8xf32>
    %36 = vector.shape_cast %35 : vector<1x8x8xf32> to vector<8x8xf32>
    %cst_24 = arith.constant dense<0.000000e+00> : vector<8x128xf32>
    %37 = tpu.matmul %36, %3, %cst_24 {dimension_numbers = #tpu.dot_dimension_numbers<[1], [0], [0], [1], [0, 0, 1, 1], [], []>} : vector<8x8xf32>, vector<8x128xf32>, vector<8x128xf32> -> vector<8x128xf32>
    %38 = arith.addf %34, %37 : vector<8x128xf32>
    %c5 = arith.constant 5 : index
    %c0_25 = arith.constant 0 : index
    %c0_26 = arith.constant 0 : index
    %39 = vector.load %arg3[%c5, %c0_25, %c0_26] : memref<9x8x8xf32, #tpu.memory_space<vmem>>, vector<1x8x8xf32>
    %40 = vector.shape_cast %39 : vector<1x8x8xf32> to vector<8x8xf32>
    %cst_27 = arith.constant dense<0.000000e+00> : vector<8x128xf32>
    %41 = tpu.matmul %40, %3, %cst_27 {dimension_numbers = #tpu.dot_dimension_numbers<[1], [0], [0], [1], [0, 0, 1, 1], [], []>} : vector<8x8xf32>, vector<8x128xf32>, vector<8x128xf32> -> vector<8x128xf32>
    %c127_i32 = arith.constant 127 : i32
    %42 = tpu.dynamic_rotate %41 by %c127_i32 dim 1 : vector<8x128xf32>, i32 -> vector<8x128xf32>
    %c5_28 = arith.constant 5 : index
    %c0_29 = arith.constant 0 : index
    %43 = vector.load %arg5[%c5_28, %c0_29] : memref<9x128xf32, #tpu.memory_space<vmem>>, vector<1x128xf32>
    %44 = vector.broadcast %43 : vector<1x128xf32> to vector<8x128xf32>
    %45 = arith.mulf %42, %44 : vector<8x128xf32>
    %46 = arith.addf %38, %45 : vector<8x128xf32>
    %c6 = arith.constant 6 : index
    %c0_30 = arith.constant 0 : index
    %c0_31 = arith.constant 0 : index
    %47 = vector.load %arg3[%c6, %c0_30, %c0_31] : memref<9x8x8xf32, #tpu.memory_space<vmem>>, vector<1x8x8xf32>
    %48 = vector.shape_cast %47 : vector<1x8x8xf32> to vector<8x8xf32>
    %cst_32 = arith.constant dense<0.000000e+00> : vector<8x128xf32>
    %49 = tpu.matmul %48, %3, %cst_32 {dimension_numbers = #tpu.dot_dimension_numbers<[1], [0], [0], [1], [0, 0, 1, 1], [], []>} : vector<8x8xf32>, vector<8x128xf32>, vector<8x128xf32> -> vector<8x128xf32>
    %c121_i32 = arith.constant 121 : i32
    %50 = tpu.dynamic_rotate %49 by %c121_i32 dim 1 : vector<8x128xf32>, i32 -> vector<8x128xf32>
    %c6_33 = arith.constant 6 : index
    %c0_34 = arith.constant 0 : index
    %51 = vector.load %arg5[%c6_33, %c0_34] : memref<9x128xf32, #tpu.memory_space<vmem>>, vector<1x128xf32>
    %52 = vector.broadcast %51 : vector<1x128xf32> to vector<8x128xf32>
    %53 = arith.mulf %50, %52 : vector<8x128xf32>
    %54 = arith.addf %46, %53 : vector<8x128xf32>
    %c7 = arith.constant 7 : index
    %c0_35 = arith.constant 0 : index
    %c0_36 = arith.constant 0 : index
    %55 = vector.load %arg3[%c7, %c0_35, %c0_36] : memref<9x8x8xf32, #tpu.memory_space<vmem>>, vector<1x8x8xf32>
    %56 = vector.shape_cast %55 : vector<1x8x8xf32> to vector<8x8xf32>
    %cst_37 = arith.constant dense<0.000000e+00> : vector<8x128xf32>
    %57 = tpu.matmul %56, %3, %cst_37 {dimension_numbers = #tpu.dot_dimension_numbers<[1], [0], [0], [1], [0, 0, 1, 1], [], []>} : vector<8x8xf32>, vector<8x128xf32>, vector<8x128xf32> -> vector<8x128xf32>
    %c120_i32 = arith.constant 120 : i32
    %58 = tpu.dynamic_rotate %57 by %c120_i32 dim 1 : vector<8x128xf32>, i32 -> vector<8x128xf32>
    %c7_38 = arith.constant 7 : index
    %c0_39 = arith.constant 0 : index
    %59 = vector.load %arg5[%c7_38, %c0_39] : memref<9x128xf32, #tpu.memory_space<vmem>>, vector<1x128xf32>
    %60 = vector.broadcast %59 : vector<1x128xf32> to vector<8x128xf32>
    %61 = arith.mulf %58, %60 : vector<8x128xf32>
    %62 = arith.addf %54, %61 : vector<8x128xf32>
    %c8 = arith.constant 8 : index
    %c0_40 = arith.constant 0 : index
    %c0_41 = arith.constant 0 : index
    %63 = vector.load %arg3[%c8, %c0_40, %c0_41] : memref<9x8x8xf32, #tpu.memory_space<vmem>>, vector<1x8x8xf32>
    %64 = vector.shape_cast %63 : vector<1x8x8xf32> to vector<8x8xf32>
    %cst_42 = arith.constant dense<0.000000e+00> : vector<8x128xf32>
    %65 = tpu.matmul %64, %3, %cst_42 {dimension_numbers = #tpu.dot_dimension_numbers<[1], [0], [0], [1], [0, 0, 1, 1], [], []>} : vector<8x8xf32>, vector<8x128xf32>, vector<8x128xf32> -> vector<8x128xf32>
    %c119_i32 = arith.constant 119 : i32
    %66 = tpu.dynamic_rotate %65 by %c119_i32 dim 1 : vector<8x128xf32>, i32 -> vector<8x128xf32>
    %c8_43 = arith.constant 8 : index
    %c0_44 = arith.constant 0 : index
    %67 = vector.load %arg5[%c8_43, %c0_44] : memref<9x128xf32, #tpu.memory_space<vmem>>, vector<1x128xf32>
    %68 = vector.broadcast %67 : vector<1x128xf32> to vector<8x128xf32>
    %69 = arith.mulf %66, %68 : vector<8x128xf32>
    %70 = arith.addf %62, %69 : vector<8x128xf32>
    %c0_45 = arith.constant 0 : index
    %c0_46 = arith.constant 0 : index
    %71 = vector.load %arg8[%c0_45, %c0_46] : memref<8x1xf32, #tpu.memory_space<vmem>>, vector<8x1xf32>
    %c0_47 = arith.constant 0 : index
    %c0_48 = arith.constant 0 : index
    %72 = vector.load %arg9[%c0_47, %c0_48] : memref<8x1xf32, #tpu.memory_space<vmem>>, vector<8x1xf32>
    %cst_49 = arith.constant dense<0.000000e+00> : vector<8xf32>
    %73 = vector.multi_reduction <add>, %70, %cst_49 [1] : vector<8x128xf32> to vector<8xf32>
    %74 = vector.shape_cast %73 : vector<8xf32> to vector<8x1xf32>
    %cst_50 = arith.constant 1.280000e+02 : f32
    %75 = vector.broadcast %cst_50 : f32 to vector<8x1xf32>
    %76 = arith.divf %74, %75 : vector<8x1xf32>
    %77 = vector.broadcast %76 : vector<8x1xf32> to vector<8x128xf32>
    %78 = arith.subf %70, %77 : vector<8x128xf32>
    %79 = arith.mulf %78, %78 : vector<8x128xf32>
    %cst_51 = arith.constant dense<0.000000e+00> : vector<8xf32>
    %80 = vector.multi_reduction <add>, %79, %cst_51 [1] : vector<8x128xf32> to vector<8xf32>
    %81 = vector.shape_cast %80 : vector<8xf32> to vector<8x1xf32>
    %cst_52 = arith.constant 1.280000e+02 : f32
    %82 = vector.broadcast %cst_52 : f32 to vector<8x1xf32>
    %83 = arith.divf %81, %82 : vector<8x1xf32>
    %cst_53 = arith.constant 9.99999974E-6 : f32
    %84 = vector.broadcast %cst_53 : f32 to vector<8x1xf32>
    %85 = arith.addf %83, %84 : vector<8x1xf32>
    %86 = math.rsqrt %85 : vector<8x1xf32>
    %87 = arith.mulf %71, %86 : vector<8x1xf32>
    %88 = vector.broadcast %87 : vector<8x1xf32> to vector<8x128xf32>
    %89 = arith.mulf %78, %88 : vector<8x128xf32>
    %90 = vector.broadcast %72 : vector<8x1xf32> to vector<8x128xf32>
    %91 = arith.addf %89, %90 : vector<8x128xf32>
    %c0_54 = arith.constant 0 : index
    %c0_55 = arith.constant 0 : index
    %92 = vector.load %arg4[%c0_54, %c0_55] : memref<8x4xf32, #tpu.memory_space<vmem>>, vector<8x4xf32>
    %c0_56 = arith.constant 0 : index
    %c0_57 = arith.constant 0 : index
    %c0_58 = arith.constant 0 : index
    %93 = vector.load %arg1[%c0_56, %c0_57, %c0_58] : memref<4x4x128xf32, #tpu.memory_space<vmem>>, vector<1x4x128xf32>
    %94 = vector.shape_cast %93 : vector<1x4x128xf32> to vector<4x128xf32>
    %cst_59 = arith.constant dense<0.000000e+00> : vector<8x128xf32>
    %95 = tpu.matmul %92, %94, %cst_59 {dimension_numbers = #tpu.dot_dimension_numbers<[1], [0], [0], [1], [0, 0, 1, 1], [], []>} : vector<8x4xf32>, vector<4x128xf32>, vector<8x128xf32> -> vector<8x128xf32>
    %c0_60 = arith.constant 0 : index
    %c0_61 = arith.constant 0 : index
    %96 = vector.load %arg10[%c0_60, %c0_61] : memref<8x1xf32, #tpu.memory_space<vmem>>, vector<8x1xf32>
    %c0_62 = arith.constant 0 : index
    %c0_63 = arith.constant 0 : index
    %97 = vector.load %arg11[%c0_62, %c0_63] : memref<8x1xf32, #tpu.memory_space<vmem>>, vector<8x1xf32>
    %cst_64 = arith.constant dense<0.000000e+00> : vector<8xf32>
    %98 = vector.multi_reduction <add>, %95, %cst_64 [1] : vector<8x128xf32> to vector<8xf32>
    %99 = vector.shape_cast %98 : vector<8xf32> to vector<8x1xf32>
    %cst_65 = arith.constant 1.280000e+02 : f32
    %100 = vector.broadcast %cst_65 : f32 to vector<8x1xf32>
    %101 = arith.divf %99, %100 : vector<8x1xf32>
    %102 = vector.broadcast %101 : vector<8x1xf32> to vector<8x128xf32>
    %103 = arith.subf %95, %102 : vector<8x128xf32>
    %104 = arith.mulf %103, %103 : vector<8x128xf32>
    %cst_66 = arith.constant dense<0.000000e+00> : vector<8xf32>
    %105 = vector.multi_reduction <add>, %104, %cst_66 [1] : vector<8x128xf32> to vector<8xf32>
    %106 = vector.shape_cast %105 : vector<8xf32> to vector<8x1xf32>
    %cst_67 = arith.constant 1.280000e+02 : f32
    %107 = vector.broadcast %cst_67 : f32 to vector<8x1xf32>
    %108 = arith.divf %106, %107 : vector<8x1xf32>
    %cst_68 = arith.constant 9.99999974E-6 : f32
    %109 = vector.broadcast %cst_68 : f32 to vector<8x1xf32>
    %110 = arith.addf %108, %109 : vector<8x1xf32>
    %111 = math.rsqrt %110 : vector<8x1xf32>
    %112 = arith.mulf %96, %111 : vector<8x1xf32>
    %113 = vector.broadcast %112 : vector<8x1xf32> to vector<8x128xf32>
    %114 = arith.mulf %103, %113 : vector<8x128xf32>
    %115 = vector.broadcast %97 : vector<8x1xf32> to vector<8x128xf32>
    %116 = arith.addf %114, %115 : vector<8x128xf32>
    %117 = arith.addf %91, %116 : vector<8x128xf32>
    %cst_69 = arith.constant 0.000000e+00 : f32
    %118 = vector.broadcast %cst_69 : f32 to vector<8x128xf32>
    %119 = arith.maximumf %117, %118 : vector<8x128xf32>
    %c0_70 = arith.constant 0 : index
    %c0_71 = arith.constant 0 : index
    %120 = vector.load %arg12[%c0_70, %c0_71] : memref<8x128xf32, #tpu.memory_space<vmem>>, vector<8x128xf32>
    tpu.vector_store %arg12[%c0_70, %c0_71], %119 {strides = array<i32>} : memref<8x128xf32, #tpu.memory_space<vmem>>, vector<8x128xf32>,
    return
  }
  func.func @transform_0(%arg0: i32) -> (i32, i32, i32) {
    %c0_i32 = arith.constant 0 : i32
    %c0_i32_0 = arith.constant 0 : i32
    %c0_i32_1 = arith.constant 0 : i32
    %c0_i32_2 = arith.constant 0 : i32
    return %c0_i32, %c0_i32_0, %c0_i32_1 : i32, i32, i32
  }
  func.func @transform_1(%arg0: i32) -> (i32, i32, i32) {
    %c0_i32 = arith.constant 0 : i32
    %c0_i32_0 = arith.constant 0 : i32
    %c0_i32_1 = arith.constant 0 : i32
    %c0_i32_2 = arith.constant 0 : i32
    return %c0_i32, %c0_i32_0, %c0_i32_1 : i32, i32, i32
  }
  func.func @transform_2(%arg0: i32) -> (i32, i32, i32) {
    %c0_i32 = arith.constant 0 : i32
    %c0_i32_0 = arith.constant 0 : i32
    %c0_i32_1 = arith.constant 0 : i32
    return %c0_i32, %arg0, %c0_i32_0 : i32, i32, i32
  }
  func.func @transform_3(%arg0: i32) -> (i32, i32) {
    %c0_i32 = arith.constant 0 : i32
    %c0_i32_0 = arith.constant 0 : i32
    return %arg0, %c0_i32 : i32, i32
  }
  func.func @transform_4(%arg0: i32) -> (i32, i32) {
    %c0_i32 = arith.constant 0 : i32
    %c0_i32_0 = arith.constant 0 : i32
    %c0_i32_1 = arith.constant 0 : i32
    return %c0_i32, %c0_i32_0 : i32, i32
  }
  func.func @transform_5(%arg0: i32) -> (i32, i32) {
    %c0_i32 = arith.constant 0 : i32
    %c0_i32_0 = arith.constant 0 : i32
    %c0_i32_1 = arith.constant 0 : i32
    return %c0_i32, %c0_i32_0 : i32, i32
  }
  func.func @transform_6(%arg0: i32) -> (i32, i32) {
    %c0_i32 = arith.constant 0 : i32
    %c0_i32_0 = arith.constant 0 : i32
    %c0_i32_1 = arith.constant 0 : i32
    return %c0_i32, %c0_i32_0 : i32, i32
  }
  func.func @transform_7(%arg0: i32) -> (i32, i32) {
    %c0_i32 = arith.constant 0 : i32
    %c0_i32_0 = arith.constant 0 : i32
    return %arg0, %c0_i32 : i32, i32
  }
  func.func @transform_8(%arg0: i32) -> (i32, i32) {
    %c0_i32 = arith.constant 0 : i32
    %c0_i32_0 = arith.constant 0 : i32
    return %arg0, %c0_i32 : i32, i32
  }
  func.func @transform_9(%arg0: i32) -> (i32, i32) {
    %c0_i32 = arith.constant 0 : i32
    %c0_i32_0 = arith.constant 0 : i32
    return %arg0, %c0_i32 : i32, i32
  }
  func.func @transform_10(%arg0: i32) -> (i32, i32) {
    %c0_i32 = arith.constant 0 : i32
    %c0_i32_0 = arith.constant 0 : i32
    return %arg0, %c0_i32 : i32, i32
  }
  func.func @transform_11(%arg0: i32) -> (i32, i32) {
    %c0_i32 = arith.constant 0 : i32
    %c0_i32_0 = arith.constant 0 : i32
    return %arg0, %c0_i32 : i32, i32
  }
}

</mosaic_0001>

<bundles_post_ra>
// kernel: tpu_custom_call.1
= control target key start
LH: loop header
LB: loop body
LE: loop exit
PB: predicated region body
PF: predicated region fallthrough
CT: control target
= control target key end

     0   :  { %vm55_vm0 = vcmask 1043456   ;;  %v1934_v2 = vmov 0.0   ;;  %vm1935_vm1 = vmmov 0   ;;  %vm51_vm2 = vcmask 31744   ;;  %s2231_s0 = inlined_call_operand.vmem [shape: f32[4,4,128], index: 0, kind: input, shape index: {}]   ;;  %s2232_s1 = inlined_call_operand.vmem [shape: f32[9,8,4], index: 1, kind: input, shape index: {}]   ;;  %s2233_s2 = inlined_call_operand.vmem [shape: f32[9,8,8], index: 2, kind: input, shape index: {}]   ;;  %s2234_s3 = inlined_call_operand.vmem [shape: f32[8,4], index: 3, kind: input, shape index: {}]   ;;  %s2235_s4 = inlined_call_operand.vmem [shape: f32[9,128], index: 4, kind: input, shape index: {}]   ;;  %s2236_s5 = inlined_call_operand.vmem [shape: f32[8,1], index: 5, kind: input, shape index: {}]   ;;  %s2237_s6 = inlined_call_operand.vmem [shape: f32[8,1], index: 6, kind: input, shape index: {}]   ;;  %s2238_s7 = inlined_call_operand.vmem [shape: f32[8,1], index: 7, kind: input, shape index: {}]   ;;  %s2239_s8 = inlined_call_operand.vmem [shape: f32[8,1], index: 8, kind: input, shape index: {}]   ;;  %s2240_s9 = inlined_call_operand.vmem [shape: f32[8,1], index: 9, kind: input, shape index: {}]   ;;  %s2241_s10 = inlined_call_operand.vmem [shape: f32[8,1], index: 10, kind: input, shape index: {}]   ;;  %s2242_s11 = inlined_call_operand.hbm [shape: f32[8,128], index: 11, kind: output, shape index: {}]  }
   0x1   :  { %v1702_v0 = vld [vmem:[%s2231_s0 + $0xc] sm:$0xf]  ;;  %v50_v1 = vld [vmem:[%s2232_s1] sm:$0xff]  ;;  %1797 = vmatprep.subr.mxu0 %v1934_v2  ;;  %1799 = vmatprep.mubr.msk.f32.mxu0 %vm1935_vm1, %v1934_v2  ;;  %v1701_v3 = vld [vmem:[%s2231_s0 + $0x8] sm:$0xf] }
   0x2   :  { %1798 = vmatpush3.msk.msra.mxu0 %vm55_vm0, %v1702_v0  ;;  %1802 = vmatprep.subr.mxu1 %v1934_v2  ;;  %v1706_v4 = vld [vmem:[%s2232_s1 + $0x8] sm:$0xff]  ;;  %v1710_v5 = vld [vmem:[%s2232_s1 + $0x10] sm:$0xff]  ;;  %v1700_v6 = vld [vmem:[%s2231_s0 + $0x4] sm:$0xf] }
   0x3   :  { %1800 = vmatmul.mubr.msk.f32.vlgmr.msra.gmra.mxu0 %vm51_vm2, %v50_v1  ;;  %1803 = vmatpush3.msk.msra.mxu1 %vm55_vm0, %v1701_v3 }
   0x4   :  { %1804 = vmatprep.mubr.msk.f32.mxu1 %vm1935_vm1, %v1934_v2  ;;  %1807 = vmatprep.subr.mxu0 %v1934_v2 }
   0x5   :  { %16 = vsyncpa [#allocation4], 0  ;;  %1805 = vmatmul.mubr.msk.f32.vlgmr.msra.gmra.mxu1 %vm51_vm2, %v1706_v4  ;;  %1808 = vmatpush3.msk.msra.mxu0 %vm55_vm0, %v1702_v0  ;;  %v1713_v7 = vld [vmem:[%s2232_s1 + $0x18] sm:$0xff]  ;;  %v43_v8 = vld [vmem:[%s2231_s0] sm:$0xf]  ;;  %s1937_s24 = smov 8  }
   0x6   :  { %1809 = vmatprep.mubr.msk.f32.mxu0 %vm1935_vm1, %v1934_v2  ;;  %1812 = vmatprep.subr.mxu1 %v1934_v2  ;;  %v1717_v9 = vld [vmem:[%s2232_s1 + $0x20] sm:$0xff]  ;;  %v1720_v10 = vld [vmem:[%s2232_s1 + $0x28] sm:$0xff]  ;;  %v1723_v11 = vld [vmem:[%s2232_s1 + $0x30] sm:$0xff]  ;;  %s1938_s25 = smov 1   ;;  %v1939_v57 = vmov 0   ;;  %vm806_vm3 = vcmask 64512  }
   0x7   :  { %1810 = vmatmul.mubr.msk.f32.vlgmr.msra.gmra.mxu0 %vm51_vm2, %v1710_v5  ;;  %1813 = vmatpush3.msk.msra.mxu1 %vm55_vm0, %v1700_v6  ;;  %v1726_v12 = vld [vmem:[%s2232_s1 + $0x38] sm:$0xff]  ;;  %v1729_v13 = vld [vmem:[%s2232_s1 + $0x40] sm:$0xff]  ;;  %s1936_s1 = smov 9  }
   0x8   :  { %1814 = vmatprep.mubr.msk.f32.mxu1 %vm1935_vm1, %v1934_v2  ;;  %1817 = vmatprep.subr.mxu0 %v1934_v2  ;;  %v2104_v33 = vld [vmem:[%s2235_s4] ss:$0 sm:$0xff]  ;;  %v2109_v34 = vld [vmem:[%s2235_s4 + $0x1] ss:$0 sm:$0xff]  ;;  %v2116_v39 = vld [vmem:[%s2235_s4 + $0x3] ss:$0 sm:$0xff] }
   0x9   :  { %1815 = vmatmul.mubr.msk.f32.vlgmr.msra.gmra.mxu1 %vm51_vm2, %v1713_v7  ;;  %1818 = vmatpush3.msk.msra.mxu0 %vm55_vm0, %v43_v8  ;;  %v777_v58 = vld [vmem:[%s2237_s6] sm:$0xff]  ;;  %v1734_v8 = vld [vmem:[%s2233_s2 + $0x8] sm:$0xff] }
   0xa   :  { %1819 = vmatprep.mubr.msk.f32.mxu0 %vm1935_vm1, %v1934_v2  ;;  %1827 = vmatprep.subr.mxu0 %v1934_v2  ;;  %v776_v62 = vld [vmem:[%s2236_s5] sm:$0xff] }
   0xb   :  { %1820 = vmatmul.mubr.msk.f32.vlgmr.msra.gmra.mxu0 %vm51_vm2, %v1717_v9  ;;  %1822 = vmatprep.subr.mxu1 %v1934_v2  ;;  %v805_v7 = vld [vmem:[%s2233_s2] sm:$0xff]  ;;  %v1737_v9 = vld [vmem:[%s2233_s2 + $0x10] sm:$0xff] }
   0xc   :  { %1828 = vmatpush3.msk.msra.mxu0 %vm55_vm0, %v1702_v0  ;;  %1829 = vmatprep.mubr.msk.f32.mxu0 %vm1935_vm1, %v1934_v2 }
   0xd   :  { %1823 = vmatpush3.msk.msra.mxu1 %vm55_vm0, %v1700_v6  ;;  %1824 = vmatprep.mubr.msk.f32.mxu1 %vm1935_vm1, %v1934_v2 }
   0xe   :  { %1825 = vmatmul.mubr.msk.f32.vlgmr.msra.gmra.mxu1 %vm51_vm2, %v1720_v10  ;;  %1832 = vmatprep.subr.mxu1 %v1934_v2  ;;  %v1740_v10 = vld [vmem:[%s2233_s2 + $0x18] sm:$0xff] }
   0xf   :  { %1830 = vmatmul.mubr.msk.f32.vlgmr.msra.gmra.mxu0 %vm51_vm2, %v1723_v11  ;;  %1833 = vmatpush3.msk.msra.mxu1 %vm55_vm0, %v1701_v3  ;;  %v1743_v11 = vld [vmem:[%s2233_s2 + $0x20] sm:$0xff] }
  0x10   :  { %1834 = vmatprep.mubr.msk.f32.mxu1 %vm1935_vm1, %v1934_v2  ;;  %1837 = vmatprep.subr.mxu0 %v1934_v2 }
  0x11   :  { %1838 = vmatpush3.msk.msra.mxu0 %vm55_vm0, %v1702_v0  ;;  %1839 = vmatprep.mubr.msk.f32.mxu0 %vm1935_vm1, %v1934_v2 }
  0x12   :  { %1835 = vmatmul.mubr.msk.f32.vlgmr.msra.gmra.mxu1 %vm51_vm2, %v1726_v12  ;;  %1842 = vmatprep.subr.mxu1 %v1934_v2  ;;  %v1745_v12 = vld [vmem:[%s2233_s2 + $0x28] sm:$0xff] }
  0x13   :  { %1840 = vmatmul.mubr.msk.f32.vlgmr.msra.gmra.mxu0 %vm51_vm2, %v1729_v13  ;;  %1847 = vmatprep.subr.mxu0 %v1934_v2  ;;  %v1748_v13 = vld [vmem:[%s2233_s2 + $0x30] sm:$0xff] }
  0x14   :  { %1844 = vmatprep.mubr.msk.f32.mxu1 %vm1935_vm1, %v1934_v2  ;;  %1849 = vmatprep.mubr.msk.f32.mxu0 %vm1935_vm1, %v1934_v2 }
  0x15   :  { %1904 = vset.pattern.permute.xlu0 %v1939_v57  ;;  %1905 = vset.pattern.permute.xlu1 %v1939_v57  ;;  %v1753_v57 = vld [vmem:[%s2235_s4 + $0x7] ss:$0 sm:$0xff] }
  0xc3   :  { %v125_v14 = vpop.f32.mrf.mxu0 }
  0xc4   :  { %129 = vrot.lane.b32.xlu0 %v125_v14, %s1936_s1  ;;  %v1751_v14 = vld [vmem:[%s2233_s2 + $0x38] sm:$0xff] }
  0xc5   :  { %v1801_v15 = vpop.f32.mrf.mxu0  ;;  %v211_v16 = vpop.f32.mrf.mxu1 }
  0xc6   :  { %v1579_v15 = vld [vmem:[%s2231_s0] sm:$0xf]  ;;  %s1940_s0 = smov 7  }
  0xc7   :  { %v1806_v17 = vpop.f32.mrf.mxu1  ;;  %v295_v18 = vpop.f32.mrf.mxu0 }
  0xc8   :  { %299 = vrot.lane.b32.xlu1 %v295_v18, %s1937_s24  ;;  %215 = vrot.lane.b32.xlu0 %v211_v16, %s1937_s24  ;;  %v1754_v16 = vld [vmem:[%s2233_s2 + $0x40] sm:$0xff]  ;;  %s1941_s2 = smov 127  }
  0xc9   :  { %v1811_v19 = vpop.f32.mrf.mxu0  ;;  %v377_v20 = vpop.f32.mrf.mxu1  ;;  %v1578_v17 = vld [vmem:[%s2234_s3] sm:$0xff]  ;;  %s1942_s3 = smov 119  }
  0xcb   :  { %v1816_v21 = vpop.f32.mrf.mxu1  ;;  %v464_v22 = vpop.f32.mrf.mxu0 }
  0xcc   :  { %381 = vrot.lane.b32.xlu1 %v377_v20, %s1938_s25 }
  0xcd   :  { %v1821_v23 = vpop.f32.mrf.mxu0 }
  0xce   :  { %v540_v24 = vpop.f32.mrf.mxu1 }
  0xcf   :  { %v616_v25 = vpop.f32.mrf.mxu0 }
  0xd0   :  { %620 = vrot.lane.b32.xlu0 %v616_v25, %s1938_s25  ;;  %v1826_v26 = vpop.f32.mrf.mxu1 }
  0xd1   :  { %v1831_v27 = vpop.f32.mrf.mxu0 }
  0xd2   :  { %v695_v28 = vpop.f32.mrf.mxu1 }
  0xd3   :  { %v771_v29 = vpop.f32.mrf.mxu0 }
  0xd4   :  { %v1836_v30 = vpop.f32.mrf.mxu1 }
  0xd5   :  { %v1841_v31 = vpop.f32.mrf.mxu0 }
 0x136   :  { %v130_v32 = vpop.permute.xlu0 %129 }
 0x137   :  { %v136_v37 = vmul.f32 %v2104_v33, %v130_v32 }
 0x13a   :  { %v300_v35 = vpop.permute.xlu1 %299  ;;  %v216_v36 = vpop.permute.xlu0 %215 }
 0x13b   :  { %v222_v38 = vmul.f32 %v2109_v34, %v216_v36  ;;  %v301_v40 = vmul.f32 %v2109_v34, %v300_v35 }
 0x13d   :  { %v223_v41 = vadd.f32 %v222_v38, %v136_v37 }
 0x13e   :  { %v382_v42 = vpop.permute.xlu1 %381 }
 0x13f   :  { %v302_v43 = vadd.f32 %v301_v40, %v223_v41  ;;  %v388_v44 = vmul.f32 %v2116_v39, %v382_v42  ;;  %v1739_v42 = vld [vmem:[%s2235_s4 + $0x2] ss:$0 sm:$0xff] }
 0x141   :  { %v389_v45 = vadd.f32 %v388_v44, %v302_v43 }
 0x142   :  { %v621_v46 = vpop.permute.xlu0 %620 }
 0x143   :  { %v468_v47 = vadd.f32 %v464_v22, %v389_v45  ;;  %v622_v48 = vmul.f32 %v2116_v39, %v621_v46 }
 0x145   :  { %v544_v49 = vadd.f32 %v540_v24, %v468_v47 }
 0x147   :  { %v623_v50 = vadd.f32 %v622_v48, %v544_v49 }
 0x149   :  { %v699_v51 = vadd.f32 %v695_v28, %v623_v50 }
 0x14b   :  { %v775_v52 = vadd.f32 %v771_v29, %v699_v51 }
 0x14d   :  { %778 = vadd.xlane.f32.xlu1 %v775_v52 }
 0x15e   :  { %798 = vperm.xlu1 %1905, %v777_v58  }
 0x1d6   :  { %v779_v53 = vpop.xlane.xlu1 %778 }
 0x1d7   :  { %v781_v54 = vmul.f32 0.0078125, %v779_v53 }
 0x1d9   :  { %v782_v55 = vsub.f32 %v775_v52, %v781_v54  ;;  %v1747_v52 = vld [vmem:[%s2235_s4 + $0x5] ss:$0 sm:$0xff]  ;;  %v1750_v54 = vld [vmem:[%s2235_s4 + $0x6] ss:$0 sm:$0xff] }
 0x1da   :  { %v799_v3 = vpop.permute.xlu1 %798 }
 0x1db   :  { %v783_v56 = vmul.f32 %v782_v55, %v782_v55 }
 0x1dd   :  { %784 = vadd.xlane.f32.xlu0 %v783_v56 }
 0x266   :  { %v785_v59 = vpop.xlane.xlu0 %784 }
 0x267   :  { %v786_v60 = vmul.f32 0.0078125, %v785_v59 }
 0x269   :  { %v787_v61 = vadd.f32 1e-05, %v786_v60 }
 0x26b   :  { %1906 = vrsqrt.f32 %v787_v61 }
 0x278   :  { %v1907_v63 = vpop.eup %1906 }
 0x279   :  { %v789_v0 = vmul.f32 %v1907_v63, %v776_v62 }
 0x27b   :  { %792 = vperm.xlu0 %1904, %v789_v0  }
 0x2f6   :  { %v793_v1 = vpop.permute.xlu0 %792 }
 0x2f7   :  { %v795_v4 = vmul.f32 %v793_v1, %v782_v55 }
 0x2f9   :  { %v801_v5 = vadd.f32 %v799_v3, %v795_v4 }
 0x2fb   :  { %v802_v6 = vmax.f32 %v801_v5, 0.0 }
 0x2fd   :  { %1843 = vmatpush3.msra.mxu1 %v802_v6  ;;  %1848 = vmatpush3.msra.mxu0 %v802_v6 }
 0x2fe   :  { %1845 = vmatmul.mubr.msk.f32.vlgmr.msra.gmra.mxu1 %vm806_vm3, %v805_v7  ;;  %1850 = vmatmul.mubr.msk.f32.vlgmr.msra.gmra.mxu0 %vm806_vm3, %v1734_v8 }
 0x2ff   :  { %1852 = vmatprep.subr.mxu1 %v1934_v2  ;;  %1857 = vmatprep.subr.mxu0 %v1934_v2 }
 0x300   :  { %1853 = vmatpush3.msra.mxu1 %v802_v6  ;;  %1858 = vmatpush3.msra.mxu0 %v802_v6 }
 0x301   :  { %1854 = vmatprep.mubr.msk.f32.mxu1 %vm1935_vm1, %v1934_v2  ;;  %1859 = vmatprep.mubr.msk.f32.mxu0 %vm1935_vm1, %v1934_v2 }
 0x302   :  { %1862 = vmatprep.subr.mxu1 %v1934_v2  ;;  %1867 = vmatprep.subr.mxu0 %v1934_v2 }
 0x303   :  { %1855 = vmatmul.mubr.msk.f32.vlgmr.msra.gmra.mxu1 %vm806_vm3, %v1737_v9  ;;  %1860 = vmatmul.mubr.msk.f32.vlgmr.msra.gmra.mxu0 %vm806_vm3, %v1740_v10 }
 0x304   :  { %1863 = vmatpush3.msra.mxu1 %v802_v6  ;;  %1868 = vmatpush3.msra.mxu0 %v802_v6 }
 0x305   :  { %1864 = vmatprep.mubr.msk.f32.mxu1 %vm1935_vm1, %v1934_v2  ;;  %1869 = vmatprep.mubr.msk.f32.mxu0 %vm1935_vm1, %v1934_v2 }
 0x306   :  { %1872 = vmatprep.subr.mxu1 %v1934_v2  ;;  %1877 = vmatprep.subr.mxu0 %v1934_v2 }
 0x307   :  { %1865 = vmatmul.mubr.msk.f32.vlgmr.msra.gmra.mxu1 %vm806_vm3, %v1743_v11  ;;  %1870 = vmatmul.mubr.msk.f32.vlgmr.msra.gmra.mxu0 %vm806_vm3, %v1745_v12 }
 0x308   :  { %1873 = vmatpush3.msra.mxu1 %v802_v6  ;;  %1878 = vmatpush3.msra.mxu0 %v802_v6 }
 0x309   :  { %1874 = vmatprep.mubr.msk.f32.mxu1 %vm1935_vm1, %v1934_v2  ;;  %1882 = vmatprep.subr.mxu1 %v1934_v2 }
 0x30a   :  { %1879 = vmatprep.mubr.msk.f32.mxu0 %vm1935_vm1, %v1934_v2  ;;  %1887 = vmatprep.subr.mxu0 %v1934_v2 }
 0x30b   :  { %1875 = vmatmul.mubr.msk.f32.vlgmr.msra.gmra.mxu1 %vm806_vm3, %v1748_v13  ;;  %1880 = vmatmul.mubr.msk.f32.vlgmr.msra.gmra.mxu0 %vm806_vm3, %v1751_v14  ;;  %v1658_v14 = vld [vmem:[%s2240_s9] sm:$0xff] }
 0x30c   :  { %1883 = vmatpush3.msra.mxu1 %v802_v6  ;;  %1884 = vmatprep.mubr.msk.f32.mxu1 %vm1935_vm1, %v1934_v2 }
 0x30d   :  { %1888 = vmatpush3.msk.msra.mxu0 %vm55_vm0, %v1579_v15  ;;  %1889 = vmatprep.mubr.msk.f32.mxu0 %vm1935_vm1, %v1934_v2 }
 0x30f   :  { %1885 = vmatmul.mubr.msk.f32.vlgmr.msra.gmra.mxu1 %vm806_vm3, %v1754_v16  ;;  %1890 = vmatmul.mubr.msk.f32.vlgmr.msra.gmra.mxu0 %vm51_vm2, %v1578_v17  ;;  %v1553_v17 = vld [vmem:[%s2239_s8] sm:$0xff]  ;;  %s1945_s8 = smov [#allocation3]  }
 0x310   :  { %s1692_s16 = sshll.u32 %s1945_s8, 4  ;;  %s1693_s16 = int_to_ptr.vmem [resolvable:$true] %s1692_s16 }
 0x311   :  { %p1917_p1 = scmp.lt.s32.totalorder %s1693_s16, %s1693_s16 }
 0x3be   :  { %v876_v18 = vpop.f32.mrf.mxu1  ;;  %v959_v19 = vpop.f32.mrf.mxu0 }
 0x3bf   :  { %880 = vrot.lane.b32.xlu1 %v876_v18, %s1936_s1  ;;  %s1943_s1 = smov 121  }
 0x3c0   :  { %v1846_v20 = vpop.f32.mrf.mxu1  ;;  %v1851_v21 = vpop.f32.mrf.mxu0 }
 0x3c1   :  { %v1552_v21 = vld [vmem:[%s2238_s7] sm:$0xff]  ;;  %s1912_s7 = scalar_lea.vmem %s1693_s16, 128 }
 0x3c2   :  { %p1913_p0 = scmp.ne.s32.totalorder %s1693_s16, %s1912_s7  ;;  %p1918_p2 = scmp.lt.s32.totalorder %s1912_s7, %s1912_s7 }
 0x3c3   :  { %v1043_v22 = vpop.f32.mrf.mxu1  ;;  %963 = vrot.lane.b32.xlu1 %v959_v19, %s1937_s24  ;;  %v1127_v23 = vpop.f32.mrf.mxu0  ;;  %s1944_s24 = smov 120  }
 0x3c4   :  { %p1919_p3 = por %p1918_p2, %p1917_p1 }
 0x3c5   :  { %v1856_v24 = vpop.f32.mrf.mxu1  ;;  %v1861_v25 = vpop.f32.mrf.mxu0 }
 0x3c6   :  { %v1659_v24 = vld [vmem:[%s2241_s10] sm:$0xff]  ;;  %p1920_p4 = pnand %p1919_p3, %p1913_p0 }
 0x3c7   :  { %v1211_v26 = vpop.f32.mrf.mxu1  ;;  %1047 = vrot.lane.b32.xlu1 %v1043_v22, %s1940_s0  ;;  %v1287_v2 = vpop.f32.mrf.mxu0 }
 0x3c9   :  { %v1866_v27 = vpop.f32.mrf.mxu1  ;;  %v1871_v28 = vpop.f32.mrf.mxu0 }
 0x3cb   :  { %v1371_v29 = vpop.f32.mrf.mxu1  ;;  %1131 = vrot.lane.b32.xlu1 %v1127_v23, %s1938_s25  ;;  %v1455_v30 = vpop.f32.mrf.mxu0 }
 0x3cd   :  { %v1876_v31 = vpop.f32.mrf.mxu1  ;;  %v1881_v32 = vpop.f32.mrf.mxu0 }
 0x3cf   :  { %v1539_v35 = vpop.f32.mrf.mxu1  ;;  %1291 = vrot.lane.b32.xlu1 %v1287_v2, %s1941_s2  ;;  %v1654_v36 = vpop.f32.mrf.mxu0 }
 0x3d0   :  { %1543 = vrot.lane.b32.xlu0 %v1539_v35, %s1942_s3 }
 0x3d1   :  { %v1886_v37 = vpop.f32.mrf.mxu1  ;;  %v1891_v38 = vpop.f32.mrf.mxu0 }
 0x3d3   :  { %1375 = vrot.lane.b32.xlu1 %v1371_v29, %s1943_s1 }
 0x3d7   :  { %1459 = vrot.lane.b32.xlu1 %v1455_v30, %s1944_s24 }
 0x3ef   :  { %1660 = vadd.xlane.f32.xlu0 %v1654_v36 }
 0x431   :  { %v881_v40 = vpop.permute.xlu1 %880 }
 0x432   :  { %v887_v45 = vmul.f32 %v2104_v33, %v881_v40 }
 0x435   :  { %v964_v41 = vpop.permute.xlu1 %963 }
 0x436   :  { %v970_v43 = vmul.f32 %v2109_v34, %v964_v41 }
 0x438   :  { %v971_v47 = vadd.f32 %v970_v43, %v887_v45 }
 0x439   :  { %v1048_v44 = vpop.permute.xlu1 %1047 }
 0x43a   :  { %v1054_v46 = vmul.f32 %v1739_v42, %v1048_v44 }
 0x43c   :  { %v1055_v49 = vadd.f32 %v1054_v46, %v971_v47 }
 0x43d   :  { %v1132_v48 = vpop.permute.xlu1 %1131 }
 0x43e   :  { %v1138_v50 = vmul.f32 %v2116_v39, %v1132_v48  ;;  %v1756_v39 = vld [vmem:[%s2235_s4 + $0x8] ss:$0 sm:$0xff] }
 0x440   :  { %v1139_v51 = vadd.f32 %v1138_v50, %v1055_v49 }
 0x441   :  { %v1292_v53 = vpop.permute.xlu1 %1291 }
 0x442   :  { %v1215_v34 = vadd.f32 %v1211_v26, %v1139_v51  ;;  %v1298_v55 = vmul.f32 %v1747_v52, %v1292_v53  ;;  %v1544_v58 = vpop.permute.xlu0 %1543 }
 0x443   :  { %v1550_v63 = vmul.f32 %v1756_v39, %v1544_v58 }
 0x444   :  { %v1299_v59 = vadd.f32 %v1298_v55, %v1215_v34 }
 0x445   :  { %v1376_v56 = vpop.permute.xlu1 %1375 }
 0x446   :  { %v1382_v33 = vmul.f32 %v1750_v54, %v1376_v56 }
 0x448   :  { %v1383_v61 = vadd.f32 %v1382_v33, %v1299_v59 }
 0x449   :  { %v1460_v60 = vpop.permute.xlu1 %1459 }
 0x44a   :  { %v1466_v62 = vmul.f32 %v1753_v57, %v1460_v60 }
 0x44c   :  { %v1467_v0 = vadd.f32 %v1466_v62, %v1383_v61 }
 0x44e   :  { %v1551_v1 = vadd.f32 %v1550_v63, %v1467_v0 }
 0x450   :  { %1554 = vadd.xlane.f32.xlu1 %v1551_v1 }
 0x478   :  { %v1661_v3 = vpop.xlane.xlu0 %1660 }
 0x479   :  { %v1662_v4 = vmul.f32 0.0078125, %v1661_v3 }
 0x47b   :  { %v1663_v5 = vsub.f32 %v1654_v36, %v1662_v4 }
 0x47d   :  { %v1664_v6 = vmul.f32 %v1663_v5, %v1663_v5 }
 0x47f   :  { %1665 = vadd.xlane.f32.xlu1 %v1664_v6 }
 0x4d9   :  { %v1555_v7 = vpop.xlane.xlu1 %1554 }
 0x4da   :  { %v1557_v8 = vmul.f32 0.0078125, %v1555_v7 }
 0x4dc   :  { %v1558_v9 = vsub.f32 %v1551_v1, %v1557_v8 }
 0x4de   :  { %v1559_v10 = vmul.f32 %v1558_v9, %v1558_v9 }
 0x4e0   :  { %1560 = vadd.xlane.f32.xlu0 %v1559_v10 }
 0x508   :  { %v1666_v11 = vpop.xlane.xlu1 %1665 }
 0x509   :  { %v1667_v12 = vmul.f32 0.0078125, %v1666_v11 }
 0x50b   :  { %v1668_v13 = vadd.f32 1e-05, %v1667_v12 }
 0x50d   :  { %1908 = vrsqrt.f32 %v1668_v13 }
 0x51a   :  { %v1909_v15 = vpop.eup %1908 }
 0x51b   :  { %v1670_v16 = vmul.f32 %v1909_v15, %v1658_v14 }
 0x51d   :  { %1673 = vperm.xlu1 %1905, %v1670_v16  }
 0x521   :  { %1574 = vperm.xlu1 %1905, %v1553_v17  }
 0x569   :  { %v1561_v18 = vpop.xlane.xlu0 %1560 }
 0x56a   :  { %v1562_v19 = vmul.f32 0.0078125, %v1561_v18 }
 0x56c   :  { %v1563_v20 = vadd.f32 1e-05, %v1562_v19 }
 0x56e   :  { %1910 = vrsqrt.f32 %v1563_v20 }
 0x57b   :  { %v1911_v22 = vpop.eup %1910 }
 0x57c   :  { %v1565_v23 = vmul.f32 %v1911_v22, %v1552_v21 }
 0x57e   :  { %1568 = vperm.xlu0 %1904, %v1565_v23  }
 0x582   :  { %1679 = vperm.xlu0 %1904, %v1659_v24  }
 0x598   :  { %v1674_v25 = vpop.permute.xlu1 %1673 }
 0x599   :  { %v1676_v27 = vmul.f32 %v1674_v25, %v1663_v5 }
 0x59c   :  { %v1575_v28 = vpop.permute.xlu1 %1574 }
 0x5f9   :  { %v1569_v26 = vpop.permute.xlu0 %1568 }
 0x5fa   :  { %v1571_v2 = vmul.f32 %v1569_v26, %v1558_v9 }
 0x5fc   :  { %v1577_v30 = vadd.f32 %v1575_v28, %v1571_v2 }
 0x5fd   :  { %v1680_v29 = vpop.permute.xlu0 %1679 }
 0x5fe   :  { %v1682_v31 = vadd.f32 %v1680_v29, %v1676_v27 }
 0x600   :  { %v1683_v32 = vadd.f32 %v1682_v31, %v1577_v30 }
 0x602   :  { %v1684_v35 = vmax.f32 %v1683_v32, 0.0 }
 0x604   :  { %1685 = vst [vmem:[#allocation3] sm:$0xff] %v1684_v35 }
 0x605   :  { %1923 = shalt.err (!%p1920_p4)
}
 0x606   :  { %1695 = dma.vmem_to_hbm [thread:$0]  %s1693_s16, 128, %s2242_s11, [#allocation4]  }
 0x607   :  { %1932 = dma.done.wait [#allocation4], 128  }
 0x608   :  { %1933 = vsyncadd [#allocation4], 4294967168 }
 0x609   :  { %1699 = vsyncpa [#allocation4], 1 }

</bundles_post_ra>
